<compile_context>
chip_gen: v6e
topology: v6e:2x2x1
jax: 0.10.0
libtpu: 0.0.40
codegen_flags: <defaults>
</compile_context>

<pallas_src>
import jax
import jax.numpy as jnp
from jax import lax
from jax.experimental import pallas as pl
from jax.experimental.pallas import tpu as pltpu


# --------------------------- fused forward kernel ----------------------------
def _make_fused_kernel(n_layers, T, tb):
    """encoder Linear -> n_layers tanh-RNN blocks -> final Linear, one batch tile."""

    def kernel(x_ref, enc_w_ref, enc_b_ref, wih_ref, whh_ref, b_ref,
               fin_w_ref, fin_b_ref, out_ref, act_ref, xw_ref):
        H = act_ref.shape[-1]

        # ---- encoder: one big (T*tb, D) @ (D, H) MXU matmul ------------------
        act_ref[...] = (
            jnp.dot(x_ref[...], enc_w_ref[...], preferred_element_type=jnp.float32)
            + enc_b_ref[...]
        )

        # ---- stacked recurrent blocks ----------------------------------------
        for l in range(n_layers):
            w_hh = whh_ref[l]  # (H, H): loaded once, resident for the whole scan

            # Hoisted input projection + bias: ONE big matmul per layer; only the
            # h_{t-1} @ W_hh recurrence stays inside the sequential loop.
            xw_ref[...] = (
                jnp.dot(act_ref[...], wih_ref[l], preferred_element_type=jnp.float32)
                + b_ref[l]
            )

            def step(t, h_prev, w_hh=w_hh):
                r = pl.multiple_of(t * tb, tb)
                h_new = jnp.tanh(
                    xw_ref[pl.ds(r, tb), :]
                    + jnp.dot(h_prev, w_hh, preferred_element_type=jnp.float32)
                )
                act_ref[pl.ds(r, tb), :] = h_new
                return h_new

            lax.fori_loop(0, T, step, jnp.zeros((tb, H), jnp.float32), unroll=True)

        # ---- final: one big (T*tb, H) @ (H, O) matmul -------------------------
        out_ref[...] = (
            jnp.dot(act_ref[...], fin_w_ref[...], preferred_element_type=jnp.float32)
            + fin_b_ref[...]
        )

    return kernel


# ------------------------------- Full model ----------------------------------
def init_params(key, input_size, hidden, output_size, n_layers):
    keys = jax.random.split(key, 3 + 3 * n_layers)
    p = {
        "enc_w": jax.random.normal(keys[0], (input_size, hidden), jnp.float32) * 0.1,
        "enc_b": jax.random.normal(keys[1], (hidden,), jnp.float32) * 0.1,
        "fin_w": jax.random.normal(keys[2], (hidden, output_size), jnp.float32) * 0.1,
        "fin_b": jnp.zeros((output_size,), jnp.float32),
        "rnns": [],
    }
    for l in range(n_layers):
        k0, k1, k2 = keys[3 + 3 * l: 6 + 3 * l]
        p["rnns"].append(
            (
                jax.random.normal(k0, (hidden, hidden), jnp.float32) * 0.1,
                jax.random.normal(k1, (hidden, hidden), jnp.float32) * 0.1,
                jax.random.normal(k2, (hidden,), jnp.float32) * 0.1,
            )
        )
    return p


def cfl_forward(x, params, training=True, block_b=8):
    """Pallas forward for CflModelWrapper. Returns (output, layer_outputs)."""
    B, T, D = x.shape
    H = params["enc_w"].shape[1]
    O = params["fin_w"].shape[1]
    L = len(params["rnns"])

    # Batch tiling: pad B to a multiple of the tile so every block/slice is
    # sublane (8)-aligned.  For realistic batches use block_b=128 to fill the MXU
    # M dimension; block_b=8 keeps padding waste tiny for small demos.
    tb = block_b
    nb = (B + tb - 1) // tb
    B_pad = nb * tb
    if B_pad != B:
        x = jnp.pad(x, ((0, B_pad - B), (0, 0), (0, 0)))

    # One rearrangement IN: (B_pad,T,D) -> (nb, T*tb, D) with rows time-major per
    # batch tile, so the kernel only ever sees 2-D slabs (no per-layer transposes,
    # no in-kernel reshapes).
    x_tiles = (x.reshape(nb, tb, T, D)
                 .transpose(0, 2, 1, 3)
                 .reshape(nb, T * tb, D))

    if L > 0:
        wih_all = jnp.stack([w for (w, _, _) in params["rnns"]])              # (L,H,H)
        whh_all = jnp.stack([w for (_, w, _) in params["rnns"]])              # (L,H,H)
        b_all = jnp.stack([b.reshape(1, H) for (_, _, b) in params["rnns"]])  # (L,1,H)
    else:  # degenerate: no recurrent blocks (kernel layer loop simply does not run)
        wih_all = jnp.zeros((1, H, H), jnp.float32)
        whh_all = jnp.zeros((1, H, H), jnp.float32)
        b_all = jnp.zeros((1, 1, H), jnp.float32)
    Lw = wih_all.shape[0]

    kernel = _make_fused_kernel(L, T, tb)
    out_tiles = pl.pallas_call(
        kernel,
        out_shape=jax.ShapeDtypeStruct((nb, T * tb, O), jnp.float32),
        grid_spec=pltpu.PrefetchScalarGridSpec(
            num_scalar_prefetch=0,
            grid=(nb,),
            in_specs=[
                pl.BlockSpec((None, T * tb, D), lambda i: (i, 0, 0)),   # x batch tile
                pl.BlockSpec((D, H), lambda i: (0, 0)),                 # enc_w
                pl.BlockSpec((1, H), lambda i: (0, 0)),                 # enc_b
                pl.BlockSpec((Lw, H, H), lambda i: (0, 0, 0)),          # W_ih stack
                pl.BlockSpec((Lw, H, H), lambda i: (0, 0, 0)),          # W_hh stack
                pl.BlockSpec((Lw, 1, H), lambda i: (0, 0, 0)),          # bias stack
                pl.BlockSpec((H, O), lambda i: (0, 0)),                 # fin_w
                pl.BlockSpec((1, O), lambda i: (0, 0)),                 # fin_b
            ],
            out_specs=pl.BlockSpec((None, T * tb, O), lambda i: (i, 0, 0)),
            scratch_shapes=[
                pltpu.VMEM((T * tb, H), jnp.float32),   # activation slab (layer in/out)
                pltpu.VMEM((T * tb, H), jnp.float32),   # hoisted x @ W_ih + b
            ],
        ),
        compiler_params=pltpu.CompilerParams(
            dimension_semantics=("parallel",),   # batch tiles -> megacore sharding
        ),
    )(x_tiles, params["enc_w"], params["enc_b"].reshape(1, H),
      wih_all, whh_all, b_all,
      params["fin_w"], params["fin_b"].reshape(1, O))

    # One rearrangement OUT: (nb, T*tb, O) -> (B, T, O)
    out = (out_tiles.reshape(nb, T, tb, O)
                    .transpose(0, 2, 1, 3)
                    .reshape(B_pad, T, O))[:B]

    # TODO(synk): capture_gate_outputs (training=False) has no defined block here;
    # training=True semantics (layer_outputs == []) are preserved.
    layer_outputs = []
    return out, layer_outputs


if __name__ == "__main__":
    key = jax.random.PRNGKey(0)
    B, T, INPUT, HIDDEN, OUTPUT, NLAYERS = 2, 8, 8, 32, 8, 2

    kx, kp = jax.random.split(key)
    x = jax.random.normal(kx, (B, T, INPUT), jnp.float32)
    params = init_params(kp, INPUT, HIDDEN, OUTPUT, NLAYERS)

    out, layer_outputs = cfl_forward(x, params, training=True)
    out = jax.block_until_ready(out)

    # quick pure-JAX reference check of the same math
    def ref_forward(x, p):
        h = x @ p["enc_w"] + p["enc_b"]
        for (wih, whh, b) in p["rnns"]:
            hs = []
            state = jnp.zeros((x.shape[0], wih.shape[1]), jnp.float32)
            for t in range(x.shape[1]):
                state = jnp.tanh(h[:, t] @ wih + state @ whh + b)
                hs.append(state)
            h = jnp.stack(hs, axis=1)
        return h @ p["fin_w"] + p["fin_b"]

    ref = ref_forward(x, params)
    assert out.shape == (B, T, OUTPUT)
    assert layer_outputs == []
    assert jnp.allclose(out, ref, atol=1e-4, rtol=1e-4)
    print("KERNEL_OK")
</pallas_src>

<mosaic_0001>
module attributes {stable_mosaic.version = 11 : i64} {
  func.func @kernel(%arg0: i32, %arg1: memref<1x64x8xf32, #tpu.memory_space<vmem>>, %arg2: memref<8x32xf32, #tpu.memory_space<vmem>>, %arg3: memref<1x32xf32, #tpu.memory_space<vmem>>, %arg4: memref<2x32x32xf32, #tpu.memory_space<vmem>>, %arg5: memref<2x32x32xf32, #tpu.memory_space<vmem>>, %arg6: memref<2x1x32xf32, #tpu.memory_space<vmem>>, %arg7: memref<32x8xf32, #tpu.memory_space<vmem>>, %arg8: memref<1x8xf32, #tpu.memory_space<vmem>>, %arg9: memref<1x64x8xf32, #tpu.memory_space<vmem>>, %arg10: memref<64x32xf32, #tpu.memory_space<vmem>>, %arg11: memref<64x32xf32, #tpu.memory_space<vmem>>) attributes {dimension_semantics = [#tpu.dimension_semantics<parallel>], iteration_bounds = array<i64: 1>, scalar_prefetch = 0 : i64, scratch_operands = 2 : i64, tpu.core_type = #tpu.core_type<tc>, window_params = [{transform_indices = @transform_0, window_bounds = array<i64: 1, 64, 8>}, {pipeline_mode = #tpu.pipeline_mode<synchronous>, transform_indices = @transform_1, window_bounds = array<i64: 8, 32>}, {pipeline_mode = #tpu.pipeline_mode<synchronous>, transform_indices = @transform_2, window_bounds = array<i64: 1, 32>}, {pipeline_mode = #tpu.pipeline_mode<synchronous>, transform_indices = @transform_3, window_bounds = array<i64: 2, 32, 32>}, {pipeline_mode = #tpu.pipeline_mode<synchronous>, transform_indices = @transform_4, window_bounds = array<i64: 2, 32, 32>}, {pipeline_mode = #tpu.pipeline_mode<synchronous>, transform_indices = @transform_5, window_bounds = array<i64: 2, 1, 32>}, {pipeline_mode = #tpu.pipeline_mode<synchronous>, transform_indices = @transform_6, window_bounds = array<i64: 32, 8>}, {pipeline_mode = #tpu.pipeline_mode<synchronous>, transform_indices = @transform_7, window_bounds = array<i64: 1, 8>}, {transform_indices = @transform_8, window_bounds = array<i64: 1, 64, 8>}]} {
    %c0 = arith.constant 0 : index
    %c0_0 = arith.constant 0 : index
    %c0_1 = arith.constant 0 : index
    %0 = vector.load %arg1[%c0, %c0_0, %c0_1] : memref<1x64x8xf32, #tpu.memory_space<vmem>>, vector<1x64x8xf32>
    %1 = vector.shape_cast %0 : vector<1x64x8xf32> to vector<64x8xf32>
    %c0_2 = arith.constant 0 : index
    %c0_3 = arith.constant 0 : index
    %2 = vector.load %arg2[%c0_2, %c0_3] : memref<8x32xf32, #tpu.memory_space<vmem>>, vector<8x32xf32>
    %cst = arith.constant dense<0.000000e+00> : vector<64x32xf32>
    %3 = tpu.matmul %1, %2, %cst {dimension_numbers = #tpu.dot_dimension_numbers<[1], [0], [0], [1], [0, 0, 1, 1], [], []>} : vector<64x8xf32>, vector<8x32xf32>, vector<64x32xf32> -> vector<64x32xf32>
    %c0_4 = arith.constant 0 : index
    %c0_5 = arith.constant 0 : index
    %4 = vector.load %arg3[%c0_4, %c0_5] : memref<1x32xf32, #tpu.memory_space<vmem>>, vector<1x32xf32>
    %5 = vector.broadcast %4 : vector<1x32xf32> to vector<64x32xf32>
    %6 = arith.addf %3, %5 : vector<64x32xf32>
    %c0_6 = arith.constant 0 : index
    %c0_7 = arith.constant 0 : index
    %7 = vector.load %arg10[%c0_6, %c0_7] : memref<64x32xf32, #tpu.memory_space<vmem>>, vector<64x32xf32>
    tpu.vector_store %arg10[%c0_6, %c0_7], %6 {strides = array<i32>} : memref<64x32xf32, #tpu.memory_space<vmem>>, vector<64x32xf32>,
    %c0_8 = arith.constant 0 : index
    %c0_9 = arith.constant 0 : index
    %c0_10 = arith.constant 0 : index
    %8 = vector.load %arg5[%c0_8, %c0_9, %c0_10] : memref<2x32x32xf32, #tpu.memory_space<vmem>>, vector<1x32x32xf32>
    %9 = vector.shape_cast %8 : vector<1x32x32xf32> to vector<32x32xf32>
    %c0_11 = arith.constant 0 : index
    %c0_12 = arith.constant 0 : index
    %10 = vector.load %arg10[%c0_11, %c0_12] : memref<64x32xf32, #tpu.memory_space<vmem>>, vector<64x32xf32>
    %c0_13 = arith.constant 0 : index
    %c0_14 = arith.constant 0 : index
    %c0_15 = arith.constant 0 : index
    %11 = vector.load %arg4[%c0_13, %c0_14, %c0_15] : memref<2x32x32xf32, #tpu.memory_space<vmem>>, vector<1x32x32xf32>
    %12 = vector.shape_cast %11 : vector<1x32x32xf32> to vector<32x32xf32>
    %cst_16 = arith.constant dense<0.000000e+00> : vector<64x32xf32>
    %13 = tpu.matmul %10, %12, %cst_16 {dimension_numbers = #tpu.dot_dimension_numbers<[1], [0], [0], [1], [0, 0, 1, 1], [], []>} : vector<64x32xf32>, vector<32x32xf32>, vector<64x32xf32> -> vector<64x32xf32>
    %c0_17 = arith.constant 0 : index
    %c0_18 = arith.constant 0 : index
    %c0_19 = arith.constant 0 : index
    %14 = vector.load %arg6[%c0_17, %c0_18, %c0_19] : memref<2x1x32xf32, #tpu.memory_space<vmem>>, vector<1x1x32xf32>
    %15 = vector.shape_cast %14 : vector<1x1x32xf32> to vector<1x32xf32>
    %16 = vector.broadcast %15 : vector<1x32xf32> to vector<64x32xf32>
    %17 = arith.addf %13, %16 : vector<64x32xf32>
    %c0_20 = arith.constant 0 : index
    %c0_21 = arith.constant 0 : index
    %18 = vector.load %arg11[%c0_20, %c0_21] : memref<64x32xf32, #tpu.memory_space<vmem>>, vector<64x32xf32>
    tpu.vector_store %arg11[%c0_20, %c0_21], %17 {strides = array<i32>} : memref<64x32xf32, #tpu.memory_space<vmem>>, vector<64x32xf32>,
    %cst_22 = arith.constant 0.000000e+00 : f32
    %19 = vector.broadcast %cst_22 : f32 to vector<8x32xf32>
    %c0_i32 = arith.constant 0 : i32
    %c8_i32 = arith.constant 8 : i32
    %20 = arith.muli %c0_i32, %c8_i32 : i32
    %21 = tpu.assume_multiple %20, 8 : i32
    %22 = arith.index_cast %21 : i32 to index
    %c0_23 = arith.constant 0 : index
    %23 = vector.load %arg11[%22, %c0_23] : memref<64x32xf32, #tpu.memory_space<vmem>>, vector<8x32xf32>
    %cst_24 = arith.constant dense<0.000000e+00> : vector<8x32xf32>
    %24 = tpu.matmul %19, %9, %cst_24 {dimension_numbers = #tpu.dot_dimension_numbers<[1], [0], [0], [1], [0, 0, 1, 1], [], []>} : vector<8x32xf32>, vector<32x32xf32>, vector<8x32xf32> -> vector<8x32xf32>
    %25 = arith.addf %23, %24 : vector<8x32xf32>
    %26 = math.tanh %25 : vector<8x32xf32>
    %27 = arith.index_cast %21 : i32 to index
    %c0_25 = arith.constant 0 : index
    %28 = vector.load %arg10[%27, %c0_25] : memref<64x32xf32, #tpu.memory_space<vmem>>, vector<8x32xf32>
    tpu.vector_store %arg10[%27, %c0_25], %26 {strides = array<i32>} : memref<64x32xf32, #tpu.memory_space<vmem>>, vector<8x32xf32>,
    %c1_i32 = arith.constant 1 : i32
    %c8_i32_26 = arith.constant 8 : i32
    %29 = arith.muli %c1_i32, %c8_i32_26 : i32
    %30 = tpu.assume_multiple %29, 8 : i32
    %31 = arith.index_cast %30 : i32 to index
    %c0_27 = arith.constant 0 : index
    %32 = vector.load %arg11[%31, %c0_27] : memref<64x32xf32, #tpu.memory_space<vmem>>, vector<8x32xf32>
    %cst_28 = arith.constant dense<0.000000e+00> : vector<8x32xf32>
    %33 = tpu.matmul %26, %9, %cst_28 {dimension_numbers = #tpu.dot_dimension_numbers<[1], [0], [0], [1], [0, 0, 1, 1], [], []>} : vector<8x32xf32>, vector<32x32xf32>, vector<8x32xf32> -> vector<8x32xf32>
    %34 = arith.addf %32, %33 : vector<8x32xf32>
    %35 = math.tanh %34 : vector<8x32xf32>
    %36 = arith.index_cast %30 : i32 to index
    %c0_29 = arith.constant 0 : index
    %37 = vector.load %arg10[%36, %c0_29] : memref<64x32xf32, #tpu.memory_space<vmem>>, vector<8x32xf32>
    tpu.vector_store %arg10[%36, %c0_29], %35 {strides = array<i32>} : memref<64x32xf32, #tpu.memory_space<vmem>>, vector<8x32xf32>,
    %c2_i32 = arith.constant 2 : i32
    %c8_i32_30 = arith.constant 8 : i32
    %38 = arith.muli %c2_i32, %c8_i32_30 : i32
    %39 = tpu.assume_multiple %38, 8 : i32
    %40 = arith.index_cast %39 : i32 to index
    %c0_31 = arith.constant 0 : index
    %41 = vector.load %arg11[%40, %c0_31] : memref<64x32xf32, #tpu.memory_space<vmem>>, vector<8x32xf32>
    %cst_32 = arith.constant dense<0.000000e+00> : vector<8x32xf32>
    %42 = tpu.matmul %35, %9, %cst_32 {dimension_numbers = #tpu.dot_dimension_numbers<[1], [0], [0], [1], [0, 0, 1, 1], [], []>} : vector<8x32xf32>, vector<32x32xf32>, vector<8x32xf32> -> vector<8x32xf32>
    %43 = arith.addf %41, %42 : vector<8x32xf32>
    %44 = math.tanh %43 : vector<8x32xf32>
    %45 = arith.index_cast %39 : i32 to index
    %c0_33 = arith.constant 0 : index
    %46 = vector.load %arg10[%45, %c0_33] : memref<64x32xf32, #tpu.memory_space<vmem>>, vector<8x32xf32>
    tpu.vector_store %arg10[%45, %c0_33], %44 {strides = array<i32>} : memref<64x32xf32, #tpu.memory_space<vmem>>, vector<8x32xf32>,
    %c3_i32 = arith.constant 3 : i32
    %c8_i32_34 = arith.constant 8 : i32
    %47 = arith.muli %c3_i32, %c8_i32_34 : i32
    %48 = tpu.assume_multiple %47, 8 : i32
    %49 = arith.index_cast %48 : i32 to index
    %c0_35 = arith.constant 0 : index
    %50 = vector.load %arg11[%49, %c0_35] : memref<64x32xf32, #tpu.memory_space<vmem>>, vector<8x32xf32>
    %cst_36 = arith.constant dense<0.000000e+00> : vector<8x32xf32>
    %51 = tpu.matmul %44, %9, %cst_36 {dimension_numbers = #tpu.dot_dimension_numbers<[1], [0], [0], [1], [0, 0, 1, 1], [], []>} : vector<8x32xf32>, vector<32x32xf32>, vector<8x32xf32> -> vector<8x32xf32>
    %52 = arith.addf %50, %51 : vector<8x32xf32>
    %53 = math.tanh %52 : vector<8x32xf32>
    %54 = arith.index_cast %48 : i32 to index
    %c0_37 = arith.constant 0 : index
    %55 = vector.load %arg10[%54, %c0_37] : memref<64x32xf32, #tpu.memory_space<vmem>>, vector<8x32xf32>
    tpu.vector_store %arg10[%54, %c0_37], %53 {strides = array<i32>} : memref<64x32xf32, #tpu.memory_space<vmem>>, vector<8x32xf32>,
    %c4_i32 = arith.constant 4 : i32
    %c8_i32_38 = arith.constant 8 : i32
    %56 = arith.muli %c4_i32, %c8_i32_38 : i32
    %57 = tpu.assume_multiple %56, 8 : i32
    %58 = arith.index_cast %57 : i32 to index
    %c0_39 = arith.constant 0 : index
    %59 = vector.load %arg11[%58, %c0_39] : memref<64x32xf32, #tpu.memory_space<vmem>>, vector<8x32xf32>
    %cst_40 = arith.constant dense<0.000000e+00> : vector<8x32xf32>
    %60 = tpu.matmul %53, %9, %cst_40 {dimension_numbers = #tpu.dot_dimension_numbers<[1], [0], [0], [1], [0, 0, 1, 1], [], []>} : vector<8x32xf32>, vector<32x32xf32>, vector<8x32xf32> -> vector<8x32xf32>
    %61 = arith.addf %59, %60 : vector<8x32xf32>
    %62 = math.tanh %61 : vector<8x32xf32>
    %63 = arith.index_cast %57 : i32 to index
    %c0_41 = arith.constant 0 : index
    %64 = vector.load %arg10[%63, %c0_41] : memref<64x32xf32, #tpu.memory_space<vmem>>, vector<8x32xf32>
    tpu.vector_store %arg10[%63, %c0_41], %62 {strides = array<i32>} : memref<64x32xf32, #tpu.memory_space<vmem>>, vector<8x32xf32>,
    %c5_i32 = arith.constant 5 : i32
    %c8_i32_42 = arith.constant 8 : i32
    %65 = arith.muli %c5_i32, %c8_i32_42 : i32
    %66 = tpu.assume_multiple %65, 8 : i32
    %67 = arith.index_cast %66 : i32 to index
    %c0_43 = arith.constant 0 : index
    %68 = vector.load %arg11[%67, %c0_43] : memref<64x32xf32, #tpu.memory_space<vmem>>, vector<8x32xf32>
    %cst_44 = arith.constant dense<0.000000e+00> : vector<8x32xf32>
    %69 = tpu.matmul %62, %9, %cst_44 {dimension_numbers = #tpu.dot_dimension_numbers<[1], [0], [0], [1], [0, 0, 1, 1], [], []>} : vector<8x32xf32>, vector<32x32xf32>, vector<8x32xf32> -> vector<8x32xf32>
    %70 = arith.addf %68, %69 : vector<8x32xf32>
    %71 = math.tanh %70 : vector<8x32xf32>
    %72 = arith.index_cast %66 : i32 to index
    %c0_45 = arith.constant 0 : index
    %73 = vector.load %arg10[%72, %c0_45] : memref<64x32xf32, #tpu.memory_space<vmem>>, vector<8x32xf32>
    tpu.vector_store %arg10[%72, %c0_45], %71 {strides = array<i32>} : memref<64x32xf32, #tpu.memory_space<vmem>>, vector<8x32xf32>,
    %c6_i32 = arith.constant 6 : i32
    %c8_i32_46 = arith.constant 8 : i32
    %74 = arith.muli %c6_i32, %c8_i32_46 : i32
    %75 = tpu.assume_multiple %74, 8 : i32
    %76 = arith.index_cast %75 : i32 to index
    %c0_47 = arith.constant 0 : index
    %77 = vector.load %arg11[%76, %c0_47] : memref<64x32xf32, #tpu.memory_space<vmem>>, vector<8x32xf32>
    %cst_48 = arith.constant dense<0.000000e+00> : vector<8x32xf32>
    %78 = tpu.matmul %71, %9, %cst_48 {dimension_numbers = #tpu.dot_dimension_numbers<[1], [0], [0], [1], [0, 0, 1, 1], [], []>} : vector<8x32xf32>, vector<32x32xf32>, vector<8x32xf32> -> vector<8x32xf32>
    %79 = arith.addf %77, %78 : vector<8x32xf32>
    %80 = math.tanh %79 : vector<8x32xf32>
    %81 = arith.index_cast %75 : i32 to index
    %c0_49 = arith.constant 0 : index
    %82 = vector.load %arg10[%81, %c0_49] : memref<64x32xf32, #tpu.memory_space<vmem>>, vector<8x32xf32>
    tpu.vector_store %arg10[%81, %c0_49], %80 {strides = array<i32>} : memref<64x32xf32, #tpu.memory_space<vmem>>, vector<8x32xf32>,
    %c7_i32 = arith.constant 7 : i32
    %c8_i32_50 = arith.constant 8 : i32
    %83 = arith.muli %c7_i32, %c8_i32_50 : i32
    %84 = tpu.assume_multiple %83, 8 : i32
    %85 = arith.index_cast %84 : i32 to index
    %c0_51 = arith.constant 0 : index
    %86 = vector.load %arg11[%85, %c0_51] : memref<64x32xf32, #tpu.memory_space<vmem>>, vector<8x32xf32>
    %cst_52 = arith.constant dense<0.000000e+00> : vector<8x32xf32>
    %87 = tpu.matmul %80, %9, %cst_52 {dimension_numbers = #tpu.dot_dimension_numbers<[1], [0], [0], [1], [0, 0, 1, 1], [], []>} : vector<8x32xf32>, vector<32x32xf32>, vector<8x32xf32> -> vector<8x32xf32>
    %88 = arith.addf %86, %87 : vector<8x32xf32>
    %89 = math.tanh %88 : vector<8x32xf32>
    %90 = arith.index_cast %84 : i32 to index
    %c0_53 = arith.constant 0 : index
    %91 = vector.load %arg10[%90, %c0_53] : memref<64x32xf32, #tpu.memory_space<vmem>>, vector<8x32xf32>
    tpu.vector_store %arg10[%90, %c0_53], %89 {strides = array<i32>} : memref<64x32xf32, #tpu.memory_space<vmem>>, vector<8x32xf32>,
    %c8_i32_54 = arith.constant 8 : i32
    %c1 = arith.constant 1 : index
    %c0_55 = arith.constant 0 : index
    %c0_56 = arith.constant 0 : index
    %92 = vector.load %arg5[%c1, %c0_55, %c0_56] : memref<2x32x32xf32, #tpu.memory_space<vmem>>, vector<1x32x32xf32>
    %93 = vector.shape_cast %92 : vector<1x32x32xf32> to vector<32x32xf32>
    %c0_57 = arith.constant 0 : index
    %c0_58 = arith.constant 0 : index
    %94 = vector.load %arg10[%c0_57, %c0_58] : memref<64x32xf32, #tpu.memory_space<vmem>>, vector<64x32xf32>
    %c1_59 = arith.constant 1 : index
    %c0_60 = arith.constant 0 : index
    %c0_61 = arith.constant 0 : index
    %95 = vector.load %arg4[%c1_59, %c0_60, %c0_61] : memref<2x32x32xf32, #tpu.memory_space<vmem>>, vector<1x32x32xf32>
    %96 = vector.shape_cast %95 : vector<1x32x32xf32> to vector<32x32xf32>
    %cst_62 = arith.constant dense<0.000000e+00> : vector<64x32xf32>
    %97 = tpu.matmul %94, %96, %cst_62 {dimension_numbers = #tpu.dot_dimension_numbers<[1], [0], [0], [1], [0, 0, 1, 1], [], []>} : vector<64x32xf32>, vector<32x32xf32>, vector<64x32xf32> -> vector<64x32xf32>
    %c1_63 = arith.constant 1 : index
    %c0_64 = arith.constant 0 : index
    %c0_65 = arith.constant 0 : index
    %98 = vector.load %arg6[%c1_63, %c0_64, %c0_65] : memref<2x1x32xf32, #tpu.memory_space<vmem>>, vector<1x1x32xf32>
    %99 = vector.shape_cast %98 : vector<1x1x32xf32> to vector<1x32xf32>
    %100 = vector.broadcast %99 : vector<1x32xf32> to vector<64x32xf32>
    %101 = arith.addf %97, %100 : vector<64x32xf32>
    %c0_66 = arith.constant 0 : index
    %c0_67 = arith.constant 0 : index
    %102 = vector.load %arg11[%c0_66, %c0_67] : memref<64x32xf32, #tpu.memory_space<vmem>>, vector<64x32xf32>
    tpu.vector_store %arg11[%c0_66, %c0_67], %101 {strides = array<i32>} : memref<64x32xf32, #tpu.memory_space<vmem>>, vector<64x32xf32>,
    %cst_68 = arith.constant 0.000000e+00 : f32
    %103 = vector.broadcast %cst_68 : f32 to vector<8x32xf32>
    %c0_i32_69 = arith.constant 0 : i32
    %c8_i32_70 = arith.constant 8 : i32
    %104 = arith.muli %c0_i32_69, %c8_i32_70 : i32
    %105 = tpu.assume_multiple %104, 8 : i32
    %106 = arith.index_cast %105 : i32 to index
    %c0_71 = arith.constant 0 : index
    %107 = vector.load %arg11[%106, %c0_71] : memref<64x32xf32, #tpu.memory_space<vmem>>, vector<8x32xf32>
    %cst_72 = arith.constant dense<0.000000e+00> : vector<8x32xf32>
    %108 = tpu.matmul %103, %93, %cst_72 {dimension_numbers = #tpu.dot_dimension_numbers<[1], [0], [0], [1], [0, 0, 1, 1], [], []>} : vector<8x32xf32>, vector<32x32xf32>, vector<8x32xf32> -> vector<8x32xf32>
    %109 = arith.addf %107, %108 : vector<8x32xf32>
    %110 = math.tanh %109 : vector<8x32xf32>
    %111 = arith.index_cast %105 : i32 to index
    %c0_73 = arith.constant 0 : index
    %112 = vector.load %arg10[%111, %c0_73] : memref<64x32xf32, #tpu.memory_space<vmem>>, vector<8x32xf32>
    tpu.vector_store %arg10[%111, %c0_73], %110 {strides = array<i32>} : memref<64x32xf32, #tpu.memory_space<vmem>>, vector<8x32xf32>,
    %c1_i32_74 = arith.constant 1 : i32
    %c8_i32_75 = arith.constant 8 : i32
    %113 = arith.muli %c1_i32_74, %c8_i32_75 : i32
    %114 = tpu.assume_multiple %113, 8 : i32
    %115 = arith.index_cast %114 : i32 to index
    %c0_76 = arith.constant 0 : index
    %116 = vector.load %arg11[%115, %c0_76] : memref<64x32xf32, #tpu.memory_space<vmem>>, vector<8x32xf32>
    %cst_77 = arith.constant dense<0.000000e+00> : vector<8x32xf32>
    %117 = tpu.matmul %110, %93, %cst_77 {dimension_numbers = #tpu.dot_dimension_numbers<[1], [0], [0], [1], [0, 0, 1, 1], [], []>} : vector<8x32xf32>, vector<32x32xf32>, vector<8x32xf32> -> vector<8x32xf32>
    %118 = arith.addf %116, %117 : vector<8x32xf32>
    %119 = math.tanh %118 : vector<8x32xf32>
    %120 = arith.index_cast %114 : i32 to index
    %c0_78 = arith.constant 0 : index
    %121 = vector.load %arg10[%120, %c0_78] : memref<64x32xf32, #tpu.memory_space<vmem>>, vector<8x32xf32>
    tpu.vector_store %arg10[%120, %c0_78], %119 {strides = array<i32>} : memref<64x32xf32, #tpu.memory_space<vmem>>, vector<8x32xf32>,
    %c2_i32_79 = arith.constant 2 : i32
    %c8_i32_80 = arith.constant 8 : i32
    %122 = arith.muli %c2_i32_79, %c8_i32_80 : i32
    %123 = tpu.assume_multiple %122, 8 : i32
    %124 = arith.index_cast %123 : i32 to index
    %c0_81 = arith.constant 0 : index
    %125 = vector.load %arg11[%124, %c0_81] : memref<64x32xf32, #tpu.memory_space<vmem>>, vector<8x32xf32>
    %cst_82 = arith.constant dense<0.000000e+00> : vector<8x32xf32>
    %126 = tpu.matmul %119, %93, %cst_82 {dimension_numbers = #tpu.dot_dimension_numbers<[1], [0], [0], [1], [0, 0, 1, 1], [], []>} : vector<8x32xf32>, vector<32x32xf32>, vector<8x32xf32> -> vector<8x32xf32>
    %127 = arith.addf %125, %126 : vector<8x32xf32>
    %128 = math.tanh %127 : vector<8x32xf32>
    %129 = arith.index_cast %123 : i32 to index
    %c0_83 = arith.constant 0 : index
    %130 = vector.load %arg10[%129, %c0_83] : memref<64x32xf32, #tpu.memory_space<vmem>>, vector<8x32xf32>
    tpu.vector_store %arg10[%129, %c0_83], %128 {strides = array<i32>} : memref<64x32xf32, #tpu.memory_space<vmem>>, vector<8x32xf32>,
    %c3_i32_84 = arith.constant 3 : i32
    %c8_i32_85 = arith.constant 8 : i32
    %131 = arith.muli %c3_i32_84, %c8_i32_85 : i32
    %132 = tpu.assume_multiple %131, 8 : i32
    %133 = arith.index_cast %132 : i32 to index
    %c0_86 = arith.constant 0 : index
    %134 = vector.load %arg11[%133, %c0_86] : memref<64x32xf32, #tpu.memory_space<vmem>>, vector<8x32xf32>
    %cst_87 = arith.constant dense<0.000000e+00> : vector<8x32xf32>
    %135 = tpu.matmul %128, %93, %cst_87 {dimension_numbers = #tpu.dot_dimension_numbers<[1], [0], [0], [1], [0, 0, 1, 1], [], []>} : vector<8x32xf32>, vector<32x32xf32>, vector<8x32xf32> -> vector<8x32xf32>
    %136 = arith.addf %134, %135 : vector<8x32xf32>
    %137 = math.tanh %136 : vector<8x32xf32>
    %138 = arith.index_cast %132 : i32 to index
    %c0_88 = arith.constant 0 : index
    %139 = vector.load %arg10[%138, %c0_88] : memref<64x32xf32, #tpu.memory_space<vmem>>, vector<8x32xf32>
    tpu.vector_store %arg10[%138, %c0_88], %137 {strides = array<i32>} : memref<64x32xf32, #tpu.memory_space<vmem>>, vector<8x32xf32>,
    %c4_i32_89 = arith.constant 4 : i32
    %c8_i32_90 = arith.constant 8 : i32
    %140 = arith.muli %c4_i32_89, %c8_i32_90 : i32
    %141 = tpu.assume_multiple %140, 8 : i32
    %142 = arith.index_cast %141 : i32 to index
    %c0_91 = arith.constant 0 : index
    %143 = vector.load %arg11[%142, %c0_91] : memref<64x32xf32, #tpu.memory_space<vmem>>, vector<8x32xf32>
    %cst_92 = arith.constant dense<0.000000e+00> : vector<8x32xf32>
    %144 = tpu.matmul %137, %93, %cst_92 {dimension_numbers = #tpu.dot_dimension_numbers<[1], [0], [0], [1], [0, 0, 1, 1], [], []>} : vector<8x32xf32>, vector<32x32xf32>, vector<8x32xf32> -> vector<8x32xf32>
    %145 = arith.addf %143, %144 : vector<8x32xf32>
    %146 = math.tanh %145 : vector<8x32xf32>
    %147 = arith.index_cast %141 : i32 to index
    %c0_93 = arith.constant 0 : index
    %148 = vector.load %arg10[%147, %c0_93] : memref<64x32xf32, #tpu.memory_space<vmem>>, vector<8x32xf32>
    tpu.vector_store %arg10[%147, %c0_93], %146 {strides = array<i32>} : memref<64x32xf32, #tpu.memory_space<vmem>>, vector<8x32xf32>,
    %c5_i32_94 = arith.constant 5 : i32
    %c8_i32_95 = arith.constant 8 : i32
    %149 = arith.muli %c5_i32_94, %c8_i32_95 : i32
    %150 = tpu.assume_multiple %149, 8 : i32
    %151 = arith.index_cast %150 : i32 to index
    %c0_96 = arith.constant 0 : index
    %152 = vector.load %arg11[%151, %c0_96] : memref<64x32xf32, #tpu.memory_space<vmem>>, vector<8x32xf32>
    %cst_97 = arith.constant dense<0.000000e+00> : vector<8x32xf32>
    %153 = tpu.matmul %146, %93, %cst_97 {dimension_numbers = #tpu.dot_dimension_numbers<[1], [0], [0], [1], [0, 0, 1, 1], [], []>} : vector<8x32xf32>, vector<32x32xf32>, vector<8x32xf32> -> vector<8x32xf32>
    %154 = arith.addf %152, %153 : vector<8x32xf32>
    %155 = math.tanh %154 : vector<8x32xf32>
    %156 = arith.index_cast %150 : i32 to index
    %c0_98 = arith.constant 0 : index
    %157 = vector.load %arg10[%156, %c0_98] : memref<64x32xf32, #tpu.memory_space<vmem>>, vector<8x32xf32>
    tpu.vector_store %arg10[%156, %c0_98], %155 {strides = array<i32>} : memref<64x32xf32, #tpu.memory_space<vmem>>, vector<8x32xf32>,
    %c6_i32_99 = arith.constant 6 : i32
    %c8_i32_100 = arith.constant 8 : i32
    %158 = arith.muli %c6_i32_99, %c8_i32_100 : i32
    %159 = tpu.assume_multiple %158, 8 : i32
    %160 = arith.index_cast %159 : i32 to index
    %c0_101 = arith.constant 0 : index
    %161 = vector.load %arg11[%160, %c0_101] : memref<64x32xf32, #tpu.memory_space<vmem>>, vector<8x32xf32>
    %cst_102 = arith.constant dense<0.000000e+00> : vector<8x32xf32>
    %162 = tpu.matmul %155, %93, %cst_102 {dimension_numbers = #tpu.dot_dimension_numbers<[1], [0], [0], [1], [0, 0, 1, 1], [], []>} : vector<8x32xf32>, vector<32x32xf32>, vector<8x32xf32> -> vector<8x32xf32>
    %163 = arith.addf %161, %162 : vector<8x32xf32>
    %164 = math.tanh %163 : vector<8x32xf32>
    %165 = arith.index_cast %159 : i32 to index
    %c0_103 = arith.constant 0 : index
    %166 = vector.load %arg10[%165, %c0_103] : memref<64x32xf32, #tpu.memory_space<vmem>>, vector<8x32xf32>
    tpu.vector_store %arg10[%165, %c0_103], %164 {strides = array<i32>} : memref<64x32xf32, #tpu.memory_space<vmem>>, vector<8x32xf32>,
    %c7_i32_104 = arith.constant 7 : i32
    %c8_i32_105 = arith.constant 8 : i32
    %167 = arith.muli %c7_i32_104, %c8_i32_105 : i32
    %168 = tpu.assume_multiple %167, 8 : i32
    %169 = arith.index_cast %168 : i32 to index
    %c0_106 = arith.constant 0 : index
    %170 = vector.load %arg11[%169, %c0_106] : memref<64x32xf32, #tpu.memory_space<vmem>>, vector<8x32xf32>
    %cst_107 = arith.constant dense<0.000000e+00> : vector<8x32xf32>
    %171 = tpu.matmul %164, %93, %cst_107 {dimension_numbers = #tpu.dot_dimension_numbers<[1], [0], [0], [1], [0, 0, 1, 1], [], []>} : vector<8x32xf32>, vector<32x32xf32>, vector<8x32xf32> -> vector<8x32xf32>
    %172 = arith.addf %170, %171 : vector<8x32xf32>
    %173 = math.tanh %172 : vector<8x32xf32>
    %174 = arith.index_cast %168 : i32 to index
    %c0_108 = arith.constant 0 : index
    %175 = vector.load %arg10[%174, %c0_108] : memref<64x32xf32, #tpu.memory_space<vmem>>, vector<8x32xf32>
    tpu.vector_store %arg10[%174, %c0_108], %173 {strides = array<i32>} : memref<64x32xf32, #tpu.memory_space<vmem>>, vector<8x32xf32>,
    %c8_i32_109 = arith.constant 8 : i32
    %c0_110 = arith.constant 0 : index
    %c0_111 = arith.constant 0 : index
    %176 = vector.load %arg10[%c0_110, %c0_111] : memref<64x32xf32, #tpu.memory_space<vmem>>, vector<64x32xf32>
    %c0_112 = arith.constant 0 : index
    %c0_113 = arith.constant 0 : index
    %177 = vector.load %arg7[%c0_112, %c0_113] : memref<32x8xf32, #tpu.memory_space<vmem>>, vector<32x8xf32>
    %cst_114 = arith.constant dense<0.000000e+00> : vector<64x8xf32>
    %178 = tpu.matmul %176, %177, %cst_114 {dimension_numbers = #tpu.dot_dimension_numbers<[1], [0], [0], [1], [0, 0, 1, 1], [], []>} : vector<64x32xf32>, vector<32x8xf32>, vector<64x8xf32> -> vector<64x8xf32>
    %c0_115 = arith.constant 0 : index
    %c0_116 = arith.constant 0 : index
    %179 = vector.load %arg8[%c0_115, %c0_116] : memref<1x8xf32, #tpu.memory_space<vmem>>, vector<1x8xf32>
    %180 = vector.broadcast %179 : vector<1x8xf32> to vector<64x8xf32>
    %181 = arith.addf %178, %180 : vector<64x8xf32>
    %c0_117 = arith.constant 0 : index
    %c0_118 = arith.constant 0 : index
    %c0_119 = arith.constant 0 : index
    %182 = vector.load %arg9[%c0_117, %c0_118, %c0_119] : memref<1x64x8xf32, #tpu.memory_space<vmem>>, vector<1x64x8xf32>
    %183 = vector.shape_cast %182 : vector<1x64x8xf32> to vector<64x8xf32>
    %184 = vector.shape_cast %181 : vector<64x8xf32> to vector<1x64x8xf32>
    tpu.vector_store %arg9[%c0_117, %c0_118, %c0_119], %184 {strides = array<i32>} : memref<1x64x8xf32, #tpu.memory_space<vmem>>, vector<1x64x8xf32>,
    return
  }
  func.func @transform_0(%arg0: i32) -> (i32, i32, i32) {
    %c0_i32 = arith.constant 0 : i32
    %c0_i32_0 = arith.constant 0 : i32
    %c0_i32_1 = arith.constant 0 : i32
    return %arg0, %c0_i32, %c0_i32_0 : i32, i32, i32
  }
  func.func @transform_1(%arg0: i32) -> (i32, i32) {
    %c0_i32 = arith.constant 0 : i32
    %c0_i32_0 = arith.constant 0 : i32
    %c0_i32_1 = arith.constant 0 : i32
    return %c0_i32, %c0_i32_0 : i32, i32
  }
  func.func @transform_2(%arg0: i32) -> (i32, i32) {
    %c0_i32 = arith.constant 0 : i32
    %c0_i32_0 = arith.constant 0 : i32
    %c0_i32_1 = arith.constant 0 : i32
    return %c0_i32, %c0_i32_0 : i32, i32
  }
  func.func @transform_3(%arg0: i32) -> (i32, i32, i32) {
    %c0_i32 = arith.constant 0 : i32
    %c0_i32_0 = arith.constant 0 : i32
    %c0_i32_1 = arith.constant 0 : i32
    %c0_i32_2 = arith.constant 0 : i32
    return %c0_i32, %c0_i32_0, %c0_i32_1 : i32, i32, i32
  }
  func.func @transform_4(%arg0: i32) -> (i32, i32, i32) {
    %c0_i32 = arith.constant 0 : i32
    %c0_i32_0 = arith.constant 0 : i32
    %c0_i32_1 = arith.constant 0 : i32
    %c0_i32_2 = arith.constant 0 : i32
    return %c0_i32, %c0_i32_0, %c0_i32_1 : i32, i32, i32
  }
  func.func @transform_5(%arg0: i32) -> (i32, i32, i32) {
    %c0_i32 = arith.constant 0 : i32
    %c0_i32_0 = arith.constant 0 : i32
    %c0_i32_1 = arith.constant 0 : i32
    %c0_i32_2 = arith.constant 0 : i32
    return %c0_i32, %c0_i32_0, %c0_i32_1 : i32, i32, i32
  }
  func.func @transform_6(%arg0: i32) -> (i32, i32) {
    %c0_i32 = arith.constant 0 : i32
    %c0_i32_0 = arith.constant 0 : i32
    %c0_i32_1 = arith.constant 0 : i32
    return %c0_i32, %c0_i32_0 : i32, i32
  }
  func.func @transform_7(%arg0: i32) -> (i32, i32) {
    %c0_i32 = arith.constant 0 : i32
    %c0_i32_0 = arith.constant 0 : i32
    %c0_i32_1 = arith.constant 0 : i32
    return %c0_i32, %c0_i32_0 : i32, i32
  }
  func.func @transform_8(%arg0: i32) -> (i32, i32, i32) {
    %c0_i32 = arith.constant 0 : i32
    %c0_i32_0 = arith.constant 0 : i32
    %c0_i32_1 = arith.constant 0 : i32
    return %arg0, %c0_i32, %c0_i32_0 : i32, i32, i32
  }
}

</mosaic_0001>

<bundles_post_ra>
// kernel: tpu_custom_call.1
= control target key start
LH: loop header
LB: loop body
LE: loop exit
PB: predicated region body
PF: predicated region fallthrough
CT: control target
= control target key end

     0   :  { %13 = vsyncpa [#allocation5], 0  ;;  %s2416_s27 = smov [#allocation4]   ;;  %s2850_s0 = inlined_call_operand.vmem [shape: f32[1,64,8], index: 0, kind: input, shape index: {}]   ;;  %s2851_s1 = inlined_call_operand.vmem [shape: f32[8,32], index: 1, kind: input, shape index: {}]   ;;  %s2852_s2 = inlined_call_operand.vmem [shape: f32[1,32], index: 2, kind: input, shape index: {}]   ;;  %s2853_s3 = inlined_call_operand.vmem [shape: f32[2,32,32], index: 3, kind: input, shape index: {}]   ;;  %s2854_s4 = inlined_call_operand.hbm [shape: f32[2,32,32], index: 4, kind: input, shape index: {}]   ;;  %s2855_s5 = inlined_call_operand.vmem [shape: f32[2,1,32], index: 5, kind: input, shape index: {}]   ;;  %s2856_s6 = inlined_call_operand.vmem [shape: f32[32,8], index: 6, kind: input, shape index: {}]   ;;  %s2857_s7 = inlined_call_operand.vmem [shape: f32[1,8], index: 7, kind: input, shape index: {}]   ;;  %s2858_s8 = inlined_call_operand.vmem [shape: f32[1,64,8], index: 8, kind: output, shape index: {}]  }
   0x1   :  { %s27_s28 = sshll.u32 %s2416_s27, 4  ;;  %s28_s28 = int_to_ptr.vmem [resolvable:$true] %s27_s28 }
   0x2   :  { %s2402_s29 = scalar_lea.vmem %s28_s28, 1024  ;;  %p2407_p1 = scmp.lt.s32.totalorder %s28_s28, %s28_s28 }
   0x3   :  { %p2403_p0 = scmp.ne.s32.totalorder %s28_s28, %s2402_s29  ;;  %p2408_p2 = scmp.lt.s32.totalorder %s2402_s29, %s2402_s29 }
   0x5   :  { %p2409_p3 = por %p2408_p2, %p2407_p1 }
   0x7   :  { %p2410_p4 = pnand %p2409_p3, %p2403_p0 }
   0x9   :  { %2413 = shalt.err (!%p2410_p4)
}
   0xa   :  { %s2417_s30 = smov 128   ;;  %s2418_s9 = smov 8  }
   0xb   :  { %33 = dma.hbm_to_vmem [thread:$0]  %s2854_s4, 1024, %s28_s28, [#allocation5], %s2417_s30, %s2417_s30, %s2418_s9  }
   0xc   :  { %2414 = dma.done.wait [#allocation5], 1024  }
   0xd   :  { %2415 = vsyncadd [#allocation5], 4294966272  ;;  %vm59_vm0 = vcmask 64512   ;;  %v51_v0 = vld [vmem:[%s2851_s1] sm:$0xff]  ;;  %v44_v2 = vld [vmem:[%s2850_s0 + $0x8] sm:$0xff]  ;;  %v2419_v14 = vmov 0.0  }
   0xe   :  { %v43_v1 = vld [vmem:[%s2850_s0] sm:$0xff]  ;;  %2105 = vmatprep.subr.mxu0 %v51_v0  ;;  %v45_v3 = vld [vmem:[%s2850_s0 + $0x10] sm:$0xff]  ;;  %2355 = vmatprep.subr.mxu1 %v51_v0  ;;  %v46_v4 = vld [vmem:[%s2850_s0 + $0x18] sm:$0xff]  ;;  %vm2420_vm1 = vmmov 0   ;;  %vm189_vm2 = vcmask 261120  }
   0xf   :  { %2107 = vmatprep.mubr.msk.f32.mxu0 %vm59_vm0, %v43_v1  ;;  %2106 = vmatpush3.msra.mxu0 %v51_v0  ;;  %v47_v5 = vld [vmem:[%s2850_s0 + $0x20] sm:$0xff]  ;;  %v48_v6 = vld [vmem:[%s2850_s0 + $0x28] sm:$0xff]  ;;  %v49_v7 = vld [vmem:[%s2850_s0 + $0x30] sm:$0xff] }
  0x10   :  { %2108 = vmatmul.mubr.msk.f32.vlgmr.msra.gmra.mxu0 %vm59_vm0, %v44_v2  ;;  %2356 = vmatpush3.msra.mxu1 %v51_v0  ;;  %v50_v8 = vld [vmem:[%s2850_s0 + $0x38] sm:$0xff]  ;;  %v212_v10 = vld [vmem:[%s2853_s3 + $0x10] sm:$0xff]  ;;  %v211_v11 = vld [vmem:[%s2853_s3 + $0x8] sm:$0xff] }
  0x11   :  { %2110 = vmatprep.mubr.msk.f32.mxu0 %vm59_vm0, %v45_v3  ;;  %2113 = vmatprep.mubr.msk.f32.mxu1 %vm59_vm0, %v47_v5  ;;  %v213_v9 = vld [vmem:[%s2853_s3 + $0x18] sm:$0xff]  ;;  %v210_v12 = vld [vmem:[%s2853_s3] sm:$0xff]  ;;  %v2519_v15 = vld [vmem:[#allocation4 + $0x10] sm:$0xff] }
  0x12   :  { %2114 = vmatmul.mubr.msk.f32.vlgmr.msra.gmra.mxu1 %vm59_vm0, %v48_v6  ;;  %2119 = vmatprep.subr.mxu1 %v213_v9  ;;  %v2516_v13 = vld [vmem:[#allocation4 + $0x18] sm:$0xff]  ;;  %v2526_v16 = vld [vmem:[#allocation4 + $0x8] sm:$0xff]  ;;  %v2530_v17 = vld [vmem:[#allocation4] sm:$0xff] }
  0x13   :  { %2116 = vmatprep.mubr.msk.f32.mxu1 %vm59_vm0, %v49_v7  ;;  %2120 = vmatpush3.msra.mxu1 %v213_v9  ;;  %v1925_v18 = vld [vmem:[%s2852_s2] ss:$0 sm:$0xff] }
  0x14   :  { %2111 = vmatmul.mubr.msk.f32.gmra.mxu0 %vm59_vm0, %v46_v4  ;;  %2121 = vmatprep.subr.mxu1 %v212_v10  ;;  %v1934_v45 = vld [vmem:[%s2855_s5] ss:$0 sm:$0xff] }
  0x15   :  { %2122 = vmatpush3.msra.mxu1 %v212_v10  ;;  %2139 = vmatprep.subr.mxu0 %v2419_v14 }
  0x16   :  { %2117 = vmatmul.mubr.msk.f32.gmra.mxu1 %vm59_vm0, %v50_v8  ;;  %2123 = vmatprep.subr.mxu1 %v211_v11 }
  0x17   :  { %2124 = vmatpush3.msra.mxu1 %v211_v11  ;;  %2147 = vmatprep.mubr.msk.f32.mxu0 %vm2420_vm1, %v2419_v14 }
  0x18   :  { %2125 = vmatprep.subr.mxu1 %v210_v12  ;;  %2140 = vmatpush3.msra.mxu0 %v2516_v13 }
  0x19   :  { %2126 = vmatpush3.msra.mxu1 %v210_v12  ;;  %2141 = vmatprep.subr.mxu0 %v2419_v14 }
  0x1a   :  { %2150 = vmatprep.subr.mxu1 %v2419_v14  ;;  %2142 = vmatpush3.msra.mxu0 %v2519_v15 }
  0x1b   :  { %2143 = vmatprep.subr.mxu0 %v2419_v14 }
  0x1c   :  { %2144 = vmatpush3.msra.mxu0 %v2526_v16 }
  0x1d   :  { %2145 = vmatprep.subr.mxu0 %v2419_v14 }
  0x1e   :  { %2146 = vmatpush3.msra.mxu0 %v2530_v17 }
  0x1f   :  { %2148 = vmatmul.mubr.f32.vlgmr.msra.gmra.mxu0 %v2419_v14  ;;  %2161 = vmatprep.subr.mxu0 %v2419_v14 }
  0x20   :  { %2162 = vmatpush3.msra.mxu0 %v2516_v13  ;;  %2169 = vmatprep.mubr.msk.f32.mxu0 %vm2420_vm1, %v2419_v14 }
  0x21   :  { %2163 = vmatprep.subr.mxu0 %v2419_v14 }
  0x22   :  { %2164 = vmatpush3.msra.mxu0 %v2519_v15 }
  0x23   :  { %2165 = vmatprep.subr.mxu0 %v2419_v14 }
  0x24   :  { %2166 = vmatpush3.msra.mxu0 %v2526_v16 }
  0x25   :  { %2167 = vmatprep.subr.mxu0 %v2419_v14 }
  0x26   :  { %2168 = vmatpush3.msra.mxu0 %v2530_v17 }
  0x27   :  { %2183 = vmatprep.subr.mxu0 %v2419_v14 }
  0xd0   :  { %v2109_v19 = vpop.f32.mrf.mxu0 }
  0xd1   :  { %v156_v20 = vadd.f32 %v2109_v19, %v1925_v18 }
  0xd2   :  { %v150_v21 = vpop.f32.mrf.mxu0  ;;  %v2115_v31 = vpop.f32.mrf.mxu1 }
  0xd3   :  { %191 = vst.msk [vmem:[#allocation2 + $0x8] sm:$0xff] %vm189_vm2, %v156_v20  ;;  %v151_v22 = vadd.f32 %v1925_v18, %v150_v21  ;;  %v176_v32 = vadd.f32 %v2115_v31, %v1925_v18  ;;  %v1950_v31 = vld [vmem:[%s2853_s3 + $0x20] sm:$0xff] }
  0xd4   :  { %v2112_v23 = vpop.f32.mrf.mxu0  ;;  %v170_v33 = vpop.f32.mrf.mxu1 }
  0xd5   :  { %190 = vst.msk [vmem:[#allocation2] sm:$0xff] %vm189_vm2, %v151_v22  ;;  %v166_v24 = vadd.f32 %v2112_v23, %v1925_v18  ;;  %195 = vst.msk [vmem:[#allocation2 + $0x28] sm:$0xff] %vm189_vm2, %v176_v32  ;;  %v171_v34 = vadd.f32 %v1925_v18, %v170_v33 }
  0xd6   :  { %v160_v25 = vpop.f32.mrf.mxu0  ;;  %v2118_v35 = vpop.f32.mrf.mxu1 }
  0xd7   :  { %193 = vst.msk [vmem:[#allocation2 + $0x18] sm:$0xff] %vm189_vm2, %v166_v24  ;;  %v161_v26 = vadd.f32 %v1925_v18, %v160_v25  ;;  %194 = vst.msk [vmem:[#allocation2 + $0x20] sm:$0xff] %vm189_vm2, %v171_v34  ;;  %v186_v36 = vadd.f32 %v2118_v35, %v1925_v18 }
  0xd8   :  { %v180_v37 = vpop.f32.mrf.mxu1 }
  0xd9   :  { %192 = vst.msk [vmem:[#allocation2 + $0x10] sm:$0xff] %vm189_vm2, %v161_v26  ;;  %197 = vst.msk [vmem:[#allocation2 + $0x38] sm:$0xff] %vm189_vm2, %v186_v36  ;;  %v181_v38 = vadd.f32 %v1925_v18, %v180_v37  ;;  %v2667_v37 = vld [vmem:[#allocation4 + $0x38] sm:$0xff] }
  0xda   :  { %v203_v28 = vld [vmem:[#allocation2 + $0x8] sm:$0xff] }
  0xdb   :  { %196 = vst.msk [vmem:[#allocation2 + $0x30] sm:$0xff] %vm189_vm2, %v181_v38  ;;  %v2670_v38 = vld [vmem:[#allocation4 + $0x30] sm:$0xff] }
  0xdc   :  { %v202_v27 = vld [vmem:[#allocation2] sm:$0xff]  ;;  %v207_v40 = vld [vmem:[#allocation2 + $0x28] sm:$0xff] }
  0xdd   :  { %2127 = vmatprep.mubr.msk.f32.mxu1 %vm189_vm2, %v202_v27 }
  0xde   :  { %2128 = vmatmul.mubr.msk.f32.vlgmr.msra.gmra.mxu1 %vm189_vm2, %v203_v28  ;;  %v205_v29 = vld [vmem:[#allocation2 + $0x18] sm:$0xff]  ;;  %v206_v39 = vld [vmem:[#allocation2 + $0x20] sm:$0xff] }
  0xdf   :  { %2151 = vmatpush3.msra.mxu1 %v2516_v13  ;;  %v428_v43 = vpop.f32.mrf.mxu0 }
  0xe0   :  { %v204_v30 = vld [vmem:[#allocation2 + $0x10] sm:$0xff]  ;;  %2152 = vmatprep.subr.mxu1 %v2419_v14  ;;  %v209_v42 = vld [vmem:[#allocation2 + $0x38] sm:$0xff] }
  0xe1   :  { %2130 = vmatprep.mubr.msk.f32.mxu1 %vm189_vm2, %v204_v30  ;;  %2153 = vmatpush3.msra.mxu1 %v2519_v15  ;;  %v2149_v44 = vpop.f32.mrf.mxu0  ;;  %v1951_v30 = vld [vmem:[%s2853_s3 + $0x28] sm:$0xff] }
  0xe2   :  { %2131 = vmatmul.mubr.msk.f32.gmra.mxu1 %vm189_vm2, %v205_v29  ;;  %2154 = vmatprep.subr.mxu1 %v2419_v14  ;;  %v208_v41 = vld [vmem:[#allocation2 + $0x30] sm:$0xff] }
  0xe3   :  { %2155 = vmatpush3.msra.mxu1 %v2526_v16  ;;  %2133 = vmatprep.mubr.msk.f32.mxu1 %vm189_vm2, %v206_v39  ;;  %v2674_v39 = vld [vmem:[#allocation4 + $0x28] sm:$0xff] }
  0xe4   :  { %2156 = vmatprep.subr.mxu1 %v2419_v14 }
  0xe5   :  { %2157 = vmatpush3.msra.mxu1 %v2530_v17 }
  0xe6   :  { %2172 = vmatprep.subr.mxu1 %v2419_v14  ;;  %2134 = vmatmul.mubr.msk.f32.gmra.mxu1 %vm189_vm2, %v207_v40  ;;  %v2678_v40 = vld [vmem:[#allocation4 + $0x20] sm:$0xff] }
  0xe7   :  { %2136 = vmatprep.mubr.msk.f32.mxu1 %vm189_vm2, %v208_v41 }
  0xea   :  { %2137 = vmatmul.mubr.msk.f32.gmra.mxu1 %vm189_vm2, %v209_v42 }
  0xeb   :  { %2158 = vmatprep.mubr.msk.f32.mxu1 %vm2420_vm1, %v2419_v14 }
 0x19e   :  { %v2129_v46 = vpop.f32.mrf.mxu1 }
 0x19f   :  { %v317_v47 = vadd.f32 %v2129_v46, %v1934_v45 }
 0x1a0   :  { %v311_v48 = vpop.f32.mrf.mxu1 }
 0x1a1   :  { %351 = vst.msk [vmem:[#allocation3 + $0x8] sm:$0xff] %vm189_vm2, %v317_v47  ;;  %v312_v49 = vadd.f32 %v1934_v45, %v311_v48 }
 0x1a2   :  { %v2132_v50 = vpop.f32.mrf.mxu1 }
 0x1a3   :  { %350 = vst.msk [vmem:[#allocation3] sm:$0xff] %vm189_vm2, %v312_v49  ;;  %v327_v51 = vadd.f32 %v2132_v50, %v1934_v45 }
 0x1a4   :  { %v321_v52 = vpop.f32.mrf.mxu1 }
 0x1a5   :  { %353 = vst.msk [vmem:[#allocation3 + $0x18] sm:$0xff] %vm189_vm2, %v327_v51  ;;  %v322_v53 = vadd.f32 %v1934_v45, %v321_v52 }
 0x1a6   :  { %v2135_v57 = vpop.f32.mrf.mxu1 }
 0x1a7   :  { %352 = vst.msk [vmem:[#allocation3 + $0x10] sm:$0xff] %vm189_vm2, %v322_v53  ;;  %v337_v58 = vadd.f32 %v2135_v57, %v1934_v45 }
 0x1a8   :  { %v331_v59 = vpop.f32.mrf.mxu1  ;;  %v436_v1 = vld [vmem:[#allocation3 + $0x8] sm:$0xff] }
 0x1a9   :  { %355 = vst.msk [vmem:[#allocation3 + $0x28] sm:$0xff] %vm189_vm2, %v337_v58  ;;  %v332_v60 = vadd.f32 %v1934_v45, %v331_v59 }
 0x1aa   :  { %v358_v54 = vld [vmem:[#allocation3] sm:$0xff]  ;;  %v2138_v61 = vpop.f32.mrf.mxu1 }
 0x1ab   :  { %v432_v55 = vadd.f32 %v428_v43, %v358_v54  ;;  %354 = vst.msk [vmem:[#allocation3 + $0x20] sm:$0xff] %vm189_vm2, %v332_v60  ;;  %v347_v62 = vadd.f32 %v2138_v61, %v1934_v45 }
 0x1ac   :  { %v341_v63 = vpop.f32.mrf.mxu1  ;;  %v594_v11 = vld [vmem:[#allocation3 + $0x18] sm:$0xff] }
 0x1ad   :  { %2362 = vtanh.f32 %v432_v55  ;;  %357 = vst.msk [vmem:[#allocation3 + $0x38] sm:$0xff] %vm189_vm2, %v347_v62  ;;  %v342_v0 = vadd.f32 %v1934_v45, %v341_v63  ;;  %v2686_v45 = vld [vmem:[%s2855_s5 + $0x1] ss:$0 sm:$0xff] }
 0x1ae   :  { %v515_v6 = vld [vmem:[#allocation3 + $0x10] sm:$0xff] }
 0x1af   :  { %356 = vst.msk [vmem:[#allocation3 + $0x30] sm:$0xff] %vm189_vm2, %v342_v0 }
 0x1b0   :  { %v752_v26 = vld [vmem:[#allocation3 + $0x28] sm:$0xff] }
 0x1b2   :  { %v673_v21 = vld [vmem:[#allocation3 + $0x20] sm:$0xff] }
 0x1b4   :  { %v910_v60 = vld [vmem:[#allocation3 + $0x38] sm:$0xff] }
 0x1b6   :  { %v831_v41 = vld [vmem:[#allocation3 + $0x30] sm:$0xff] }
 0x1ba   :  { %v2363_v56 = vpop.eup %2362 }
 0x1bb   :  { %434 = vst.msk [vmem:[#allocation2] sm:$0xff] %vm189_vm2, %v2363_v56  ;;  %2159 = vmatmul.mubr.msk.f32.vlgmr.msra.gmra.mxu1 %vm189_vm2, %v2363_v56 }
 0x1bc   :  { %2173 = vmatpush3.msra.mxu1 %v2516_v13  ;;  %2180 = vmatprep.mubr.msk.f32.mxu1 %vm2420_vm1, %v2419_v14 }
 0x1bd   :  { %2174 = vmatprep.subr.mxu1 %v2419_v14 }
 0x1be   :  { %2175 = vmatpush3.msra.mxu1 %v2519_v15 }
 0x1bf   :  { %2176 = vmatprep.subr.mxu1 %v2419_v14 }
 0x1c0   :  { %2177 = vmatpush3.msra.mxu1 %v2526_v16 }
 0x1c1   :  { %2178 = vmatprep.subr.mxu1 %v2419_v14 }
 0x1c2   :  { %2179 = vmatpush3.msra.mxu1 %v2530_v17 }
 0x1c3   :  { %2194 = vmatprep.subr.mxu1 %v2419_v14 }
 0x27b   :  { %v506_v2 = vpop.f32.mrf.mxu1 }
 0x27c   :  { %v510_v3 = vadd.f32 %v506_v2, %v436_v1 }
 0x27d   :  { %v2160_v4 = vpop.f32.mrf.mxu1 }
 0x27e   :  { %2364 = vtanh.f32 %v510_v3 }
 0x28b   :  { %v2365_v5 = vpop.eup %2364 }
 0x28c   :  { %513 = vst.msk [vmem:[#allocation2 + $0x8] sm:$0xff] %vm189_vm2, %v2365_v5  ;;  %2170 = vmatmul.mubr.msk.f32.vlgmr.msra.gmra.mxu0 %vm189_vm2, %v2365_v5 }
 0x28d   :  { %2184 = vmatpush3.msra.mxu0 %v2516_v13  ;;  %2191 = vmatprep.mubr.msk.f32.mxu0 %vm2420_vm1, %v2419_v14 }
 0x28e   :  { %2185 = vmatprep.subr.mxu0 %v2419_v14 }
 0x28f   :  { %2186 = vmatpush3.msra.mxu0 %v2519_v15 }
 0x290   :  { %2187 = vmatprep.subr.mxu0 %v2419_v14 }
 0x291   :  { %2188 = vmatpush3.msra.mxu0 %v2526_v16 }
 0x292   :  { %2189 = vmatprep.subr.mxu0 %v2419_v14 }
 0x293   :  { %2190 = vmatpush3.msra.mxu0 %v2530_v17  ;;  %v994_v32 = vld [vmem:[#allocation2 + $0x8] sm:$0xff] }
 0x294   :  { %2205 = vmatprep.subr.mxu0 %v2419_v14 }
 0x34c   :  { %v585_v7 = vpop.f32.mrf.mxu0 }
 0x34d   :  { %v589_v8 = vadd.f32 %v585_v7, %v515_v6 }
 0x34e   :  { %v2171_v9 = vpop.f32.mrf.mxu0 }
 0x34f   :  { %2366 = vtanh.f32 %v589_v8 }
 0x35c   :  { %v2367_v10 = vpop.eup %2366 }
 0x35d   :  { %592 = vst.msk [vmem:[#allocation2 + $0x10] sm:$0xff] %vm189_vm2, %v2367_v10  ;;  %2181 = vmatmul.mubr.msk.f32.vlgmr.msra.gmra.mxu1 %vm189_vm2, %v2367_v10 }
 0x35e   :  { %2195 = vmatpush3.msra.mxu1 %v2516_v13  ;;  %2202 = vmatprep.mubr.msk.f32.mxu1 %vm2420_vm1, %v2419_v14 }
 0x35f   :  { %2196 = vmatprep.subr.mxu1 %v2419_v14 }
 0x360   :  { %2197 = vmatpush3.msra.mxu1 %v2519_v15 }
 0x361   :  { %2198 = vmatprep.subr.mxu1 %v2419_v14 }
 0x362   :  { %2199 = vmatpush3.msra.mxu1 %v2526_v16 }
 0x363   :  { %2200 = vmatprep.subr.mxu1 %v2419_v14 }
 0x364   :  { %2201 = vmatpush3.msra.mxu1 %v2530_v17  ;;  %v995_v33 = vld [vmem:[#allocation2 + $0x10] sm:$0xff] }
 0x365   :  { %2216 = vmatprep.subr.mxu1 %v2419_v14 }
 0x41d   :  { %v664_v12 = vpop.f32.mrf.mxu1 }
 0x41e   :  { %v668_v18 = vadd.f32 %v664_v12, %v594_v11 }
 0x41f   :  { %v2182_v19 = vpop.f32.mrf.mxu1 }
 0x420   :  { %2368 = vtanh.f32 %v668_v18 }
 0x42d   :  { %v2369_v20 = vpop.eup %2368 }
 0x42e   :  { %671 = vst.msk [vmem:[#allocation2 + $0x18] sm:$0xff] %vm189_vm2, %v2369_v20  ;;  %2192 = vmatmul.mubr.msk.f32.vlgmr.msra.gmra.mxu0 %vm189_vm2, %v2369_v20 }
 0x42f   :  { %2206 = vmatpush3.msra.mxu0 %v2516_v13  ;;  %2213 = vmatprep.mubr.msk.f32.mxu0 %vm2420_vm1, %v2419_v14 }
 0x430   :  { %2207 = vmatprep.subr.mxu0 %v2419_v14 }
 0x431   :  { %2208 = vmatpush3.msra.mxu0 %v2519_v15 }
 0x432   :  { %2209 = vmatprep.subr.mxu0 %v2419_v14 }
 0x433   :  { %2210 = vmatpush3.msra.mxu0 %v2526_v16 }
 0x434   :  { %2211 = vmatprep.subr.mxu0 %v2419_v14 }
 0x435   :  { %2212 = vmatpush3.msra.mxu0 %v2530_v17  ;;  %v996_v34 = vld [vmem:[#allocation2 + $0x18] sm:$0xff] }
 0x4ee   :  { %v743_v22 = vpop.f32.mrf.mxu0 }
 0x4ef   :  { %v747_v23 = vadd.f32 %v743_v22, %v673_v21 }
 0x4f0   :  { %v2193_v24 = vpop.f32.mrf.mxu0 }
 0x4f1   :  { %2370 = vtanh.f32 %v747_v23 }
 0x4fe   :  { %v2371_v25 = vpop.eup %2370 }
 0x4ff   :  { %750 = vst.msk [vmem:[#allocation2 + $0x20] sm:$0xff] %vm189_vm2, %v2371_v25  ;;  %2203 = vmatmul.mubr.msk.f32.vlgmr.msra.gmra.mxu1 %vm189_vm2, %v2371_v25 }
 0x500   :  { %2217 = vmatpush3.msra.mxu1 %v2516_v13  ;;  %2224 = vmatprep.mubr.msk.f32.mxu1 %vm2420_vm1, %v2419_v14  ;;  %v1953_v13 = vld [vmem:[%s2853_s3 + $0x38] sm:$0xff] }
 0x501   :  { %2218 = vmatprep.subr.mxu1 %v2419_v14  ;;  %2227 = vmatprep.subr.mxu0 %v1953_v13 }
 0x502   :  { %2219 = vmatpush3.msra.mxu1 %v2519_v15 }
 0x503   :  { %2220 = vmatprep.subr.mxu1 %v2419_v14 }
 0x504   :  { %2221 = vmatpush3.msra.mxu1 %v2526_v16  ;;  %v1952_v16 = vld [vmem:[%s2853_s3 + $0x30] sm:$0xff] }
 0x505   :  { %2222 = vmatprep.subr.mxu1 %v2419_v14 }
 0x506   :  { %2223 = vmatpush3.msra.mxu1 %v2530_v17  ;;  %v993_v17 = vld [vmem:[#allocation2] sm:$0xff] }
 0x507   :  { %2247 = vmatprep.subr.mxu1 %v2419_v14  ;;  %v997_v35 = vld [vmem:[#allocation2 + $0x20] sm:$0xff] }
 0x5bf   :  { %v822_v27 = vpop.f32.mrf.mxu1 }
 0x5c0   :  { %v826_v28 = vadd.f32 %v822_v27, %v752_v26 }
 0x5c1   :  { %v2204_v29 = vpop.f32.mrf.mxu1 }
 0x5c2   :  { %2372 = vtanh.f32 %v826_v28 }
 0x5cf   :  { %v2373_v15 = vpop.eup %2372 }
 0x5d0   :  { %829 = vst.msk [vmem:[#allocation2 + $0x28] sm:$0xff] %vm189_vm2, %v2373_v15  ;;  %2214 = vmatmul.mubr.msk.f32.vlgmr.msra.gmra.mxu0 %vm189_vm2, %v2373_v15 }
 0x5d1   :  { %2228 = vmatpush3.msra.mxu0 %v1953_v13  ;;  %2235 = vmatprep.mubr.msk.f32.mxu0 %vm189_vm2, %v993_v17 }
 0x5d2   :  { %2229 = vmatprep.subr.mxu0 %v1952_v16 }
 0x5d3   :  { %2230 = vmatpush3.msra.mxu0 %v1952_v16 }
 0x5d4   :  { %2231 = vmatprep.subr.mxu0 %v1951_v30 }
 0x5d5   :  { %2232 = vmatpush3.msra.mxu0 %v1951_v30 }
 0x5d6   :  { %2233 = vmatprep.subr.mxu0 %v1950_v31 }
 0x5d7   :  { %2234 = vmatpush3.msra.mxu0 %v1950_v31  ;;  %v998_v36 = vld [vmem:[#allocation2 + $0x28] sm:$0xff] }
 0x5d8   :  { %2236 = vmatmul.mubr.msk.f32.vlgmr.msra.gmra.mxu0 %vm189_vm2, %v994_v32  ;;  %2269 = vmatprep.subr.mxu0 %v2419_v14  ;;  %v1775_v32 = vld [vmem:[%s2856_s6 + $0x18] sm:$0xff] }
 0x5d9   :  { %2238 = vmatprep.mubr.msk.f32.mxu0 %vm189_vm2, %v995_v33  ;;  %2270 = vmatpush3.msra.mxu0 %v2667_v37 }
 0x5da   :  { %2271 = vmatprep.subr.mxu0 %v2419_v14 }
 0x5db   :  { %2272 = vmatpush3.msra.mxu0 %v2670_v38 }
 0x5dc   :  { %2239 = vmatmul.mubr.msk.f32.gmra.mxu0 %vm189_vm2, %v996_v34  ;;  %2273 = vmatprep.subr.mxu0 %v2419_v14 }
 0x5dd   :  { %2241 = vmatprep.mubr.msk.f32.mxu0 %vm189_vm2, %v997_v35  ;;  %2274 = vmatpush3.msra.mxu0 %v2674_v39 }
 0x5de   :  { %2275 = vmatprep.subr.mxu0 %v2419_v14 }
 0x5df   :  { %2276 = vmatpush3.msra.mxu0 %v2678_v40 }
 0x5e0   :  { %2242 = vmatmul.mubr.msk.f32.gmra.mxu0 %vm189_vm2, %v998_v36  ;;  %2291 = vmatprep.subr.mxu0 %v2419_v14 }
 0x690   :  { %v901_v42 = vpop.f32.mrf.mxu0 }
 0x691   :  { %v905_v43 = vadd.f32 %v901_v42, %v831_v41 }
 0x692   :  { %v2215_v44 = vpop.f32.mrf.mxu0 }
 0x693   :  { %2374 = vtanh.f32 %v905_v43 }
 0x698   :  { %v2237_v46 = vpop.f32.mrf.mxu0 }
 0x699   :  { %v1110_v47 = vadd.f32 %v2237_v46, %v2686_v45 }
 0x69a   :  { %v1104_v48 = vpop.f32.mrf.mxu0 }
 0x69b   :  { %1144 = vst.msk [vmem:[#allocation3 + $0x8] sm:$0xff] %vm189_vm2, %v1110_v47  ;;  %v1105_v49 = vadd.f32 %v2686_v45, %v1104_v48 }
 0x69c   :  { %v2240_v50 = vpop.f32.mrf.mxu0 }
 0x69d   :  { %1143 = vst.msk [vmem:[#allocation3] sm:$0xff] %vm189_vm2, %v1105_v49  ;;  %v1120_v51 = vadd.f32 %v2240_v50, %v2686_v45  ;;  %v1971_v50 = vld [vmem:[%s2857_s7] ss:$0 sm:$0xff] }
 0x69e   :  { %v1114_v52 = vpop.f32.mrf.mxu0 }
 0x69f   :  { %1146 = vst.msk [vmem:[#allocation3 + $0x18] sm:$0xff] %vm189_vm2, %v1120_v51  ;;  %v1115_v53 = vadd.f32 %v2686_v45, %v1114_v52 }
 0x6a0   :  { %v2375_v54 = vpop.eup %2374  ;;  %v2243_v55 = vpop.f32.mrf.mxu0 }
 0x6a1   :  { %908 = vst.msk [vmem:[#allocation2 + $0x30] sm:$0xff] %vm189_vm2, %v2375_v54  ;;  %1145 = vst.msk [vmem:[#allocation3 + $0x10] sm:$0xff] %vm189_vm2, %v1115_v53  ;;  %v1130_v56 = vadd.f32 %v2243_v55, %v2686_v45  ;;  %2225 = vmatmul.mubr.msk.f32.vlgmr.msra.gmra.mxu1 %vm189_vm2, %v2375_v54 }
 0x6a2   :  { %v1124_v57 = vpop.f32.mrf.mxu0  ;;  %2248 = vmatpush3.msra.mxu1 %v2667_v37  ;;  %2255 = vmatprep.mubr.msk.f32.mxu1 %vm2420_vm1, %v2419_v14  ;;  %v1225_v7 = vld [vmem:[#allocation3 + $0x8] sm:$0xff] }
 0x6a3   :  { %1148 = vst.msk [vmem:[#allocation3 + $0x28] sm:$0xff] %vm189_vm2, %v1130_v56  ;;  %v1125_v58 = vadd.f32 %v2686_v45, %v1124_v57  ;;  %2249 = vmatprep.subr.mxu1 %v2419_v14 }
 0x6a4   :  { %2250 = vmatpush3.msra.mxu1 %v2670_v38  ;;  %v1151_v0 = vld [vmem:[#allocation3] sm:$0xff] }
 0x6a5   :  { %1147 = vst.msk [vmem:[#allocation3 + $0x20] sm:$0xff] %vm189_vm2, %v1125_v58  ;;  %2251 = vmatprep.subr.mxu1 %v2419_v14 }
 0x6a6   :  { %2252 = vmatpush3.msra.mxu1 %v2674_v39  ;;  %v1379_v13 = vld [vmem:[#allocation3 + $0x18] sm:$0xff] }
 0x6a7   :  { %2253 = vmatprep.subr.mxu1 %v2419_v14 }
 0x6a8   :  { %2254 = vmatpush3.msra.mxu1 %v2678_v40  ;;  %v999_v59 = vld [vmem:[#allocation2 + $0x30] sm:$0xff] }
 0x6a9   :  { %2256 = vmatmul.mubr.f32.vlgmr.msra.gmra.mxu1 %v2419_v14  ;;  %2244 = vmatprep.mubr.msk.f32.mxu0 %vm189_vm2, %v999_v59  ;;  %v1302_v21 = vld [vmem:[#allocation3 + $0x10] sm:$0xff] }
 0x6aa   :  { %2258 = vmatprep.subr.mxu1 %v2419_v14  ;;  %2266 = vmatprep.mubr.msk.f32.mxu1 %vm2420_vm1, %v2419_v14  ;;  %v1533_v33 = vld [vmem:[#allocation3 + $0x28] sm:$0xff] }
 0x6ab   :  { %2259 = vmatpush3.msra.mxu1 %v2667_v37 }
 0x6ac   :  { %2260 = vmatprep.subr.mxu1 %v2419_v14  ;;  %v1456_v15 = vld [vmem:[#allocation3 + $0x20] sm:$0xff] }
 0x6ad   :  { %2261 = vmatpush3.msra.mxu1 %v2670_v38 }
 0x6ae   :  { %2262 = vmatprep.subr.mxu1 %v2419_v14 }
 0x6af   :  { %2263 = vmatpush3.msra.mxu1 %v2674_v39 }
 0x6b0   :  { %2264 = vmatprep.subr.mxu1 %v2419_v14 }
 0x6b1   :  { %2265 = vmatpush3.msra.mxu1 %v2678_v40 }
 0x6b2   :  { %2280 = vmatprep.subr.mxu1 %v2419_v14 }
 0x761   :  { %v980_v61 = vpop.f32.mrf.mxu1 }
 0x762   :  { %v984_v62 = vadd.f32 %v980_v61, %v910_v60 }
 0x763   :  { %v2226_v63 = vpop.f32.mrf.mxu1 }
 0x764   :  { %2376 = vtanh.f32 %v984_v62 }
 0x769   :  { %v1218_v1 = vpop.f32.mrf.mxu1 }
 0x76a   :  { %v1222_v2 = vadd.f32 %v1218_v1, %v1151_v0 }
 0x76b   :  { %v2257_v3 = vpop.f32.mrf.mxu1 }
 0x76c   :  { %2378 = vtanh.f32 %v1222_v2 }
 0x771   :  { %v2377_v4 = vpop.eup %2376 }
 0x772   :  { %987 = vst.msk [vmem:[#allocation2 + $0x38] sm:$0xff] %vm189_vm2, %v2377_v4 }
 0x779   :  { %v2379_v5 = vpop.eup %2378  ;;  %v1000_v6 = vld [vmem:[#allocation2 + $0x38] sm:$0xff] }
 0x77a   :  { %1224 = vst.msk [vmem:[#allocation2] sm:$0xff] %vm189_vm2, %v2379_v5  ;;  %2267 = vmatmul.mubr.msk.f32.vlgmr.msra.gmra.mxu1 %vm189_vm2, %v2379_v5  ;;  %2245 = vmatmul.mubr.msk.f32.gmra.mxu0 %vm189_vm2, %v1000_v6 }
 0x77b   :  { %2277 = vmatprep.mubr.msk.f32.mxu0 %vm2420_vm1, %v2419_v14  ;;  %2281 = vmatpush3.msra.mxu1 %v2667_v37 }
 0x77c   :  { %2282 = vmatprep.subr.mxu1 %v2419_v14  ;;  %2288 = vmatprep.mubr.msk.f32.mxu1 %vm2420_vm1, %v2419_v14 }
 0x77d   :  { %2283 = vmatpush3.msra.mxu1 %v2670_v38 }
 0x77e   :  { %2284 = vmatprep.subr.mxu1 %v2419_v14 }
 0x77f   :  { %2285 = vmatpush3.msra.mxu1 %v2674_v39 }
 0x780   :  { %2286 = vmatprep.subr.mxu1 %v2419_v14 }
 0x781   :  { %2287 = vmatpush3.msra.mxu1 %v2678_v40 }
 0x782   :  { %2302 = vmatprep.subr.mxu1 %v2419_v14 }
 0x83a   :  { %v1295_v8 = vpop.f32.mrf.mxu1  ;;  %v2246_v9 = vpop.f32.mrf.mxu0 }
 0x83b   :  { %v1299_v10 = vadd.f32 %v1295_v8, %v1225_v7  ;;  %v1140_v11 = vadd.f32 %v2246_v9, %v2686_v45 }
 0x83c   :  { %v2268_v12 = vpop.f32.mrf.mxu1  ;;  %v1134_v18 = vpop.f32.mrf.mxu0 }
 0x83d   :  { %2380 = vtanh.f32 %v1299_v10  ;;  %1150 = vst.msk [vmem:[#allocation3 + $0x38] sm:$0xff] %vm189_vm2, %v1140_v11  ;;  %v1135_v19 = vadd.f32 %v2686_v45, %v1134_v18 }
 0x83f   :  { %1149 = vst.msk [vmem:[#allocation3 + $0x30] sm:$0xff] %vm189_vm2, %v1135_v19 }
 0x844   :  { %v1687_v1 = vld [vmem:[#allocation3 + $0x38] sm:$0xff] }
 0x846   :  { %v1610_v46 = vld [vmem:[#allocation3 + $0x30] sm:$0xff] }
 0x84a   :  { %v2381_v20 = vpop.eup %2380 }
 0x84b   :  { %1301 = vst.msk [vmem:[#allocation2 + $0x8] sm:$0xff] %vm189_vm2, %v2381_v20  ;;  %2278 = vmatmul.mubr.msk.f32.vlgmr.msra.gmra.mxu0 %vm189_vm2, %v2381_v20 }
 0x84c   :  { %2292 = vmatpush3.msra.mxu0 %v2667_v37  ;;  %2299 = vmatprep.mubr.msk.f32.mxu0 %vm2420_vm1, %v2419_v14 }
 0x84d   :  { %2293 = vmatprep.subr.mxu0 %v2419_v14 }
 0x84e   :  { %2294 = vmatpush3.msra.mxu0 %v2670_v38 }
 0x84f   :  { %2295 = vmatprep.subr.mxu0 %v2419_v14 }
 0x850   :  { %2296 = vmatpush3.msra.mxu0 %v2674_v39 }
 0x851   :  { %2297 = vmatprep.subr.mxu0 %v2419_v14 }
 0x852   :  { %2298 = vmatpush3.msra.mxu0 %v2678_v40  ;;  %v1765_v41 = vld [vmem:[#allocation2 + $0x8] sm:$0xff] }
 0x853   :  { %2313 = vmatprep.subr.mxu0 %v2419_v14 }
 0x90b   :  { %v1372_v22 = vpop.f32.mrf.mxu0 }
 0x90c   :  { %v1376_v23 = vadd.f32 %v1372_v22, %v1302_v21 }
 0x90d   :  { %v2279_v24 = vpop.f32.mrf.mxu0 }
 0x90e   :  { %2382 = vtanh.f32 %v1376_v23 }
 0x91b   :  { %v2383_v25 = vpop.eup %2382 }
 0x91c   :  { %1378 = vst.msk [vmem:[#allocation2 + $0x10] sm:$0xff] %vm189_vm2, %v2383_v25  ;;  %2289 = vmatmul.mubr.msk.f32.vlgmr.msra.gmra.mxu1 %vm189_vm2, %v2383_v25 }
 0x91d   :  { %2303 = vmatpush3.msra.mxu1 %v2667_v37  ;;  %2310 = vmatprep.mubr.msk.f32.mxu1 %vm2420_vm1, %v2419_v14 }
 0x91e   :  { %2304 = vmatprep.subr.mxu1 %v2419_v14 }
 0x91f   :  { %2305 = vmatpush3.msra.mxu1 %v2670_v38 }
 0x920   :  { %2306 = vmatprep.subr.mxu1 %v2419_v14 }
 0x921   :  { %2307 = vmatpush3.msra.mxu1 %v2674_v39 }
 0x922   :  { %2308 = vmatprep.subr.mxu1 %v2419_v14 }
 0x923   :  { %2309 = vmatpush3.msra.mxu1 %v2678_v40  ;;  %v1766_v42 = vld [vmem:[#allocation2 + $0x10] sm:$0xff] }
 0x924   :  { %2324 = vmatprep.subr.mxu1 %v2419_v14 }
 0x9dc   :  { %v1449_v26 = vpop.f32.mrf.mxu1 }
 0x9dd   :  { %v1453_v27 = vadd.f32 %v1449_v26, %v1379_v13 }
 0x9de   :  { %v2290_v28 = vpop.f32.mrf.mxu1 }
 0x9df   :  { %2384 = vtanh.f32 %v1453_v27 }
 0x9ec   :  { %v2385_v29 = vpop.eup %2384 }
 0x9ed   :  { %1455 = vst.msk [vmem:[#allocation2 + $0x18] sm:$0xff] %vm189_vm2, %v2385_v29  ;;  %2300 = vmatmul.mubr.msk.f32.vlgmr.msra.gmra.mxu0 %vm189_vm2, %v2385_v29 }
 0x9ee   :  { %2314 = vmatpush3.msra.mxu0 %v2667_v37  ;;  %2321 = vmatprep.mubr.msk.f32.mxu0 %vm2420_vm1, %v2419_v14 }
 0x9ef   :  { %2315 = vmatprep.subr.mxu0 %v2419_v14 }
 0x9f0   :  { %2316 = vmatpush3.msra.mxu0 %v2670_v38 }
 0x9f1   :  { %2317 = vmatprep.subr.mxu0 %v2419_v14 }
 0x9f2   :  { %2318 = vmatpush3.msra.mxu0 %v2674_v39 }
 0x9f3   :  { %2319 = vmatprep.subr.mxu0 %v2419_v14 }
 0x9f4   :  { %2320 = vmatpush3.msra.mxu0 %v2678_v40  ;;  %v1767_v43 = vld [vmem:[#allocation2 + $0x18] sm:$0xff] }
 0x9f5   :  { %2335 = vmatprep.subr.mxu0 %v1775_v32 }
 0xaad   :  { %v1526_v16 = vpop.f32.mrf.mxu0 }
 0xaae   :  { %v1530_v17 = vadd.f32 %v1526_v16, %v1456_v15 }
 0xaaf   :  { %v2301_v30 = vpop.f32.mrf.mxu0 }
 0xab0   :  { %2386 = vtanh.f32 %v1530_v17 }
 0xabd   :  { %v2387_v31 = vpop.eup %2386 }
 0xabe   :  { %1532 = vst.msk [vmem:[#allocation2 + $0x20] sm:$0xff] %vm189_vm2, %v2387_v31  ;;  %2311 = vmatmul.mubr.msk.f32.vlgmr.msra.gmra.mxu1 %vm189_vm2, %v2387_v31 }
 0xabf   :  { %2325 = vmatpush3.msra.mxu1 %v2667_v37  ;;  %2332 = vmatprep.mubr.msk.f32.mxu1 %vm2420_vm1, %v2419_v14 }
 0xac0   :  { %2326 = vmatprep.subr.mxu1 %v2419_v14 }
 0xac1   :  { %2327 = vmatpush3.msra.mxu1 %v2670_v38  ;;  %v1774_v38 = vld [vmem:[%s2856_s6 + $0x10] sm:$0xff] }
 0xac2   :  { %2328 = vmatprep.subr.mxu1 %v2419_v14 }
 0xac3   :  { %2329 = vmatpush3.msra.mxu1 %v2674_v39  ;;  %v1773_v39 = vld [vmem:[%s2856_s6 + $0x8] sm:$0xff] }
 0xac4   :  { %2330 = vmatprep.subr.mxu1 %v2419_v14  ;;  %v1764_v14 = vld [vmem:[#allocation2] sm:$0xff] }
 0xac5   :  { %2331 = vmatpush3.msra.mxu1 %v2678_v40  ;;  %v1772_v40 = vld [vmem:[%s2856_s6] sm:$0xff] }
 0xac6   :  { %v1768_v44 = vld [vmem:[#allocation2 + $0x20] sm:$0xff] }
 0xb7e   :  { %v1603_v34 = vpop.f32.mrf.mxu1 }
 0xb7f   :  { %v1607_v35 = vadd.f32 %v1603_v34, %v1533_v33 }
 0xb80   :  { %v2312_v36 = vpop.f32.mrf.mxu1 }
 0xb81   :  { %2388 = vtanh.f32 %v1607_v35 }
 0xb8e   :  { %v2389_v37 = vpop.eup %2388 }
 0xb8f   :  { %1609 = vst.msk [vmem:[#allocation2 + $0x28] sm:$0xff] %vm189_vm2, %v2389_v37  ;;  %2322 = vmatmul.mubr.msk.f32.vlgmr.msra.gmra.mxu0 %vm189_vm2, %v2389_v37 }
 0xb90   :  { %2336 = vmatpush3.msra.mxu0 %v1775_v32  ;;  %2343 = vmatprep.mubr.msk.f32.mxu0 %vm189_vm2, %v1764_v14 }
 0xb91   :  { %2337 = vmatprep.subr.mxu0 %v1774_v38 }
 0xb92   :  { %2338 = vmatpush3.msra.mxu0 %v1774_v38 }
 0xb93   :  { %2339 = vmatprep.subr.mxu0 %v1773_v39 }
 0xb94   :  { %2340 = vmatpush3.msra.mxu0 %v1773_v39 }
 0xb95   :  { %2341 = vmatprep.subr.mxu0 %v1772_v40 }
 0xb96   :  { %2342 = vmatpush3.msra.mxu0 %v1772_v40  ;;  %v1769_v45 = vld [vmem:[#allocation2 + $0x28] sm:$0xff] }
 0xb97   :  { %2344 = vmatmul.mubr.msk.f32.vlgmr.msra.gmra.mxu0 %vm189_vm2, %v1765_v41 }
 0xb98   :  { %2346 = vmatprep.mubr.msk.f32.mxu0 %vm189_vm2, %v1766_v42 }
 0xb9b   :  { %2347 = vmatmul.mubr.msk.f32.gmra.mxu0 %vm189_vm2, %v1767_v43 }
 0xb9c   :  { %2349 = vmatprep.mubr.msk.f32.mxu0 %vm189_vm2, %v1768_v44 }
 0xb9f   :  { %2350 = vmatmul.mubr.msk.f32.gmra.mxu0 %vm189_vm2, %v1769_v45 }
 0xc4f   :  { %v1680_v47 = vpop.f32.mrf.mxu0 }
 0xc50   :  { %v1684_v48 = vadd.f32 %v1680_v47, %v1610_v46 }
 0xc51   :  { %v2323_v49 = vpop.f32.mrf.mxu0 }
 0xc52   :  { %2390 = vtanh.f32 %v1684_v48 }
 0xc57   :  { %v2345_v51 = vpop.f32.mrf.mxu0 }
 0xc58   :  { %v1879_v52 = vadd.f32 %v2345_v51, %v1971_v50 }
 0xc59   :  { %v1873_v53 = vpop.f32.mrf.mxu0 }
 0xc5a   :  { %1913 = vst.msk [vmem:[%s2858_s8 + $0x8] sm:$0xff] %vm59_vm0, %v1879_v52  ;;  %v1874_v54 = vadd.f32 %v1971_v50, %v1873_v53 }
 0xc5b   :  { %v2348_v55 = vpop.f32.mrf.mxu0 }
 0xc5c   :  { %1912 = vst.msk [vmem:[%s2858_s8] sm:$0xff] %vm59_vm0, %v1874_v54  ;;  %v1889_v56 = vadd.f32 %v2348_v55, %v1971_v50 }
 0xc5d   :  { %v1883_v57 = vpop.f32.mrf.mxu0 }
 0xc5e   :  { %1915 = vst.msk [vmem:[%s2858_s8 + $0x18] sm:$0xff] %vm59_vm0, %v1889_v56  ;;  %v1884_v58 = vadd.f32 %v1971_v50, %v1883_v57 }
 0xc5f   :  { %v2391_v59 = vpop.eup %2390  ;;  %v2351_v60 = vpop.f32.mrf.mxu0 }
 0xc60   :  { %1686 = vst.msk [vmem:[#allocation2 + $0x30] sm:$0xff] %vm189_vm2, %v2391_v59  ;;  %v1899_v61 = vadd.f32 %v2351_v60, %v1971_v50  ;;  %2333 = vmatmul.mubr.msk.f32.vlgmr.msra.gmra.mxu1 %vm189_vm2, %v2391_v59 }
 0xc61   :  { %1914 = vst.msk [vmem:[%s2858_s8 + $0x10] sm:$0xff] %vm59_vm0, %v1884_v58  ;;  %v1893_v62 = vpop.f32.mrf.mxu0 }
 0xc62   :  { %1917 = vst.msk [vmem:[%s2858_s8 + $0x28] sm:$0xff] %vm59_vm0, %v1899_v61  ;;  %v1894_v63 = vadd.f32 %v1971_v50, %v1893_v62 }
 0xc64   :  { %1916 = vst.msk [vmem:[%s2858_s8 + $0x20] sm:$0xff] %vm59_vm0, %v1894_v63 }
 0xc67   :  { %v1770_v0 = vld [vmem:[#allocation2 + $0x30] sm:$0xff] }
 0xc68   :  { %2352 = vmatprep.mubr.msk.f32.mxu0 %vm189_vm2, %v1770_v0 }
 0xd20   :  { %v1757_v2 = vpop.f32.mrf.mxu1 }
 0xd21   :  { %v1761_v3 = vadd.f32 %v1757_v2, %v1687_v1 }
 0xd22   :  { %v2334_v4 = vpop.f32.mrf.mxu1 }
 0xd23   :  { %2392 = vtanh.f32 %v1761_v3 }
 0xd30   :  { %v2393_v5 = vpop.eup %2392 }
 0xd31   :  { %1763 = vst.msk [vmem:[#allocation2 + $0x38] sm:$0xff] %vm189_vm2, %v2393_v5 }
 0xd38   :  { %v1771_v6 = vld [vmem:[#allocation2 + $0x38] sm:$0xff] }
 0xd39   :  { %2353 = vmatmul.mubr.msk.f32.gmra.mxu0 %vm189_vm2, %v1771_v6 }
 0xdf9   :  { %v2354_v7 = vpop.f32.mrf.mxu0 }
 0xdfa   :  { %v1909_v8 = vadd.f32 %v2354_v7, %v1971_v50 }
 0xdfb   :  { %v1903_v9 = vpop.f32.mrf.mxu0 }
 0xdfc   :  { %1919 = vst.msk [vmem:[%s2858_s8 + $0x38] sm:$0xff] %vm59_vm0, %v1909_v8  ;;  %v1904_v10 = vadd.f32 %v1971_v50, %v1903_v9 }
 0xdfe   :  { %1918 = vst.msk [vmem:[%s2858_s8 + $0x30] sm:$0xff] %vm59_vm0, %v1904_v10 }
 0xdff   :  { %1924 = vsyncpa [#allocation5], 1 }

</bundles_post_ra>
